<compile_context>
chip_gen: v6e
topology: v6e:2x2x1
jax: 0.10.0
libtpu: 0.0.40
codegen_flags: <defaults>
</compile_context>

<pallas_src>
import functools

import jax
import jax.numpy as jnp
from jax.experimental import pallas as pl
from jax.experimental.pallas import tpu as pltpu


def _conv_bias_relu_kernel(x_ref, w_ref, b_ref, o_ref):
    # x_ref: (N, K, M)   im2col patches, K = Cin*KH*KW, M = Ho*Wo (lane-dense)
    # w_ref: (Cout, K)   flattened conv weights (same K ordering as x_ref)
    # b_ref: (Cout, 1)   bias
    # o_ref: (N, Cout, M) channel-major output (256-wide unmasked stores)
    n_batch = x_ref.shape[0]
    w = w_ref[...]                              # (Cout, K)
    b = b_ref[...]                              # (Cout, 1)
    for n in range(n_batch):                    # N=2, unrolled; RHS stays hot in MXU
        acc = jnp.dot(w, x_ref[n],
                      preferred_element_type=jnp.float32)   # (Cout, M), f32 acc
        acc = jnp.maximum(acc + b, 0.0)                      # bias + ReLU epilogue
        o_ref[n] = acc.astype(o_ref.dtype)


def conv_module_forward(x_nchw, weight_oihw, bias, *, padding=1):
    """ConvModule forward: Conv2d(stride=1, dilation=1, groups=1) + bias + ReLU."""
    N, Cin, H, W = x_nchw.shape
    Cout, _, KH, KW = weight_oihw.shape

    # --- plain-JAX glue: zero pad + im2col (input ~10 KB, 9x blow-up is trivial)
    x_pad = jnp.pad(x_nchw, ((0, 0), (0, 0),
                             (padding, padding), (padding, padding)))
    Hp, Wp = H + 2 * padding, W + 2 * padding
    Ho, Wo = Hp - KH + 1, Wp - KW + 1           # stride 1
    M = Ho * Wo                                 # 256 -> multiple of 128 (lane axis)
    K = Cin * KH * KW                           # 36  -> single contraction

    # K ordered as (cin, kh, kw), matching weight_oihw.reshape(Cout, Cin*KH*KW).
    taps = [x_pad[:, :, kh:kh + Ho, kw:kw + Wo]
            for kh in range(KH) for kw in range(KW)]         # each (N, Cin, Ho, Wo)
    x_cols = jnp.stack(taps, axis=2).reshape(N, K, M)        # (N, K, M)

    w2d = weight_oihw.reshape(Cout, K)                       # (Cout, K)
    b2d = bias.reshape(Cout, 1)                              # (Cout, 1)

    out_flat = pl.pallas_call(
        _conv_bias_relu_kernel,
        out_shape=jax.ShapeDtypeStruct((N, Cout, M), x_nchw.dtype),
        grid_spec=pltpu.PrefetchScalarGridSpec(
            num_scalar_prefetch=0,
            grid=(1,),   # fold batch: whole problem fits VMEM, one grid step
            in_specs=[
                pl.BlockSpec((N, K, M), lambda i: (0, 0, 0)),
                pl.BlockSpec((Cout, K), lambda i: (0, 0)),
                pl.BlockSpec((Cout, 1), lambda i: (0, 0)),
            ],
            out_specs=pl.BlockSpec((N, Cout, M), lambda i: (0, 0, 0)),
        ),
        compiler_params=pltpu.CompilerParams(
            dimension_semantics=("arbitrary",)),
    )(x_cols, w2d, b2d)

    # Channel-major already; contiguous (free) reshape back to NCHW.
    return out_flat.reshape(N, Cout, Ho, Wo)


def reference_forward(x_nchw, weight_oihw, bias, *, padding=1):
    y = jax.lax.conv_general_dilated(
        x_nchw, weight_oihw, window_strides=(1, 1),
        padding=[(padding, padding), (padding, padding)],
        dimension_numbers=("NCHW", "OIHW", "NCHW"))
    y = y + bias[None, :, None, None]
    return jnp.maximum(y, 0.0)


if __name__ == "__main__":
    # Module config: ConvModule(in_channels=4, out_channels=8, kernel_size=3,
    #                           stride=1, padding=1)  -> conv(bias=True) + ReLU
    N, Cin, H, W = 2, 4, 16, 16
    Cout, KH, KW = 8, 3, 3
    padding = 1

    key = jax.random.PRNGKey(0)
    kx, kw, kb = jax.random.split(key, 3)

    x = jax.random.normal(kx, (N, Cin, H, W), dtype=jnp.float32)

    # Deterministic kaiming-style init (relu nonlinearity), as in init_weights().
    fan_in = Cin * KH * KW
    kaiming_std = (2.0 / fan_in) ** 0.5
    weight = jax.random.normal(kw, (Cout, Cin, KH, KW),
                               dtype=jnp.float32) * kaiming_std
    bound = 1.0 / (fan_in ** 0.5)
    bias = jax.random.uniform(kb, (Cout,), minval=-bound, maxval=bound,
                              dtype=jnp.float32)

    out = conv_module_forward(x, weight, bias, padding=padding)
    out = jax.block_until_ready(out)

    ref = reference_forward(x, weight, bias, padding=padding)
    assert out.shape == (N, Cout, H, W)
    assert jnp.allclose(out, ref, atol=1e-4, rtol=1e-4)

    print("KERNEL_OK")
</pallas_src>

<mosaic_0001>
module attributes {stable_mosaic.version = 11 : i64} {
  func.func @_conv_bias_relu_kernel(%arg0: i32, %arg1: memref<2x36x256xf32, #tpu.memory_space<vmem>>, %arg2: memref<8x36xf32, #tpu.memory_space<vmem>>, %arg3: memref<8x1xf32, #tpu.memory_space<vmem>>, %arg4: memref<2x8x256xf32, #tpu.memory_space<vmem>>) attributes {dimension_semantics = [#tpu.dimension_semantics<arbitrary>], iteration_bounds = array<i64: 1>, scalar_prefetch = 0 : i64, scratch_operands = 0 : i64, tpu.core_type = #tpu.core_type<tc>, window_params = [{pipeline_mode = #tpu.pipeline_mode<synchronous>, transform_indices = @transform_0, window_bounds = array<i64: 2, 36, 256>}, {pipeline_mode = #tpu.pipeline_mode<synchronous>, transform_indices = @transform_1, window_bounds = array<i64: 8, 36>}, {pipeline_mode = #tpu.pipeline_mode<synchronous>, transform_indices = @transform_2, window_bounds = array<i64: 8, 1>}, {pipeline_mode = #tpu.pipeline_mode<synchronous>, transform_indices = @transform_3, window_bounds = array<i64: 2, 8, 256>}]} {
    %c0 = arith.constant 0 : index
    %c0_0 = arith.constant 0 : index
    %0 = vector.load %arg2[%c0, %c0_0] : memref<8x36xf32, #tpu.memory_space<vmem>>, vector<8x36xf32>
    %c0_1 = arith.constant 0 : index
    %c0_2 = arith.constant 0 : index
    %1 = vector.load %arg3[%c0_1, %c0_2] : memref<8x1xf32, #tpu.memory_space<vmem>>, vector<8x1xf32>
    %c0_3 = arith.constant 0 : index
    %c0_4 = arith.constant 0 : index
    %c0_5 = arith.constant 0 : index
    %2 = vector.load %arg1[%c0_3, %c0_4, %c0_5] : memref<2x36x256xf32, #tpu.memory_space<vmem>>, vector<1x36x256xf32>
    %3 = vector.shape_cast %2 : vector<1x36x256xf32> to vector<36x256xf32>
    %cst = arith.constant dense<0.000000e+00> : vector<8x256xf32>
    %4 = tpu.matmul %0, %3, %cst {dimension_numbers = #tpu.dot_dimension_numbers<[1], [0], [0], [1], [0, 0, 1, 1], [], []>} : vector<8x36xf32>, vector<36x256xf32>, vector<8x256xf32> -> vector<8x256xf32>
    %5 = vector.broadcast %1 : vector<8x1xf32> to vector<8x256xf32>
    %6 = arith.addf %4, %5 : vector<8x256xf32>
    %cst_6 = arith.constant 0.000000e+00 : f32
    %7 = vector.broadcast %cst_6 : f32 to vector<8x256xf32>
    %8 = arith.maximumf %6, %7 : vector<8x256xf32>
    %c0_7 = arith.constant 0 : index
    %c0_8 = arith.constant 0 : index
    %c0_9 = arith.constant 0 : index
    %9 = vector.load %arg4[%c0_7, %c0_8, %c0_9] : memref<2x8x256xf32, #tpu.memory_space<vmem>>, vector<1x8x256xf32>
    %10 = vector.shape_cast %9 : vector<1x8x256xf32> to vector<8x256xf32>
    %11 = vector.shape_cast %8 : vector<8x256xf32> to vector<1x8x256xf32>
    tpu.vector_store %arg4[%c0_7, %c0_8, %c0_9], %11 {strides = array<i32>} : memref<2x8x256xf32, #tpu.memory_space<vmem>>, vector<1x8x256xf32>,
    %c1 = arith.constant 1 : index
    %c0_10 = arith.constant 0 : index
    %c0_11 = arith.constant 0 : index
    %12 = vector.load %arg1[%c1, %c0_10, %c0_11] : memref<2x36x256xf32, #tpu.memory_space<vmem>>, vector<1x36x256xf32>
    %13 = vector.shape_cast %12 : vector<1x36x256xf32> to vector<36x256xf32>
    %cst_12 = arith.constant dense<0.000000e+00> : vector<8x256xf32>
    %14 = tpu.matmul %0, %13, %cst_12 {dimension_numbers = #tpu.dot_dimension_numbers<[1], [0], [0], [1], [0, 0, 1, 1], [], []>} : vector<8x36xf32>, vector<36x256xf32>, vector<8x256xf32> -> vector<8x256xf32>
    %15 = vector.broadcast %1 : vector<8x1xf32> to vector<8x256xf32>
    %16 = arith.addf %14, %15 : vector<8x256xf32>
    %cst_13 = arith.constant 0.000000e+00 : f32
    %17 = vector.broadcast %cst_13 : f32 to vector<8x256xf32>
    %18 = arith.maximumf %16, %17 : vector<8x256xf32>
    %c1_14 = arith.constant 1 : index
    %c0_15 = arith.constant 0 : index
    %c0_16 = arith.constant 0 : index
    %19 = vector.load %arg4[%c1_14, %c0_15, %c0_16] : memref<2x8x256xf32, #tpu.memory_space<vmem>>, vector<1x8x256xf32>
    %20 = vector.shape_cast %19 : vector<1x8x256xf32> to vector<8x256xf32>
    %21 = vector.shape_cast %18 : vector<8x256xf32> to vector<1x8x256xf32>
    tpu.vector_store %arg4[%c1_14, %c0_15, %c0_16], %21 {strides = array<i32>} : memref<2x8x256xf32, #tpu.memory_space<vmem>>, vector<1x8x256xf32>,
    return
  }
  func.func @transform_0(%arg0: i32) -> (i32, i32, i32) {
    %c0_i32 = arith.constant 0 : i32
    %c0_i32_0 = arith.constant 0 : i32
    %c0_i32_1 = arith.constant 0 : i32
    %c0_i32_2 = arith.constant 0 : i32
    return %c0_i32, %c0_i32_0, %c0_i32_1 : i32, i32, i32
  }
  func.func @transform_1(%arg0: i32) -> (i32, i32) {
    %c0_i32 = arith.constant 0 : i32
    %c0_i32_0 = arith.constant 0 : i32
    %c0_i32_1 = arith.constant 0 : i32
    return %c0_i32, %c0_i32_0 : i32, i32
  }
  func.func @transform_2(%arg0: i32) -> (i32, i32) {
    %c0_i32 = arith.constant 0 : i32
    %c0_i32_0 = arith.constant 0 : i32
    %c0_i32_1 = arith.constant 0 : i32
    return %c0_i32, %c0_i32_0 : i32, i32
  }
  func.func @transform_3(%arg0: i32) -> (i32, i32, i32) {
    %c0_i32 = arith.constant 0 : i32
    %c0_i32_0 = arith.constant 0 : i32
    %c0_i32_1 = arith.constant 0 : i32
    %c0_i32_2 = arith.constant 0 : i32
    return %c0_i32, %c0_i32_0, %c0_i32_1 : i32, i32, i32
  }
}

</mosaic_0001>

<bundles_post_ra>
// kernel: tpu_custom_call.1
= control target key start
LH: loop header
LB: loop body
LE: loop exit
PB: predicated region body
PF: predicated region fallthrough
CT: control target
= control target key end

     0   :  { %vm36_vm0 = vcmask 1043456   ;;  %s365_s0 = inlined_call_operand.vmem [shape: f32[2,36,256], index: 0, kind: input, shape index: {}]   ;;  %s366_s1 = inlined_call_operand.vmem [shape: f32[8,36], index: 1, kind: input, shape index: {}]   ;;  %s367_s2 = inlined_call_operand.vmem [shape: f32[8,1], index: 2, kind: input, shape index: {}]   ;;  %s368_s3 = inlined_call_operand.hbm [shape: f32[2,8,256], index: 3, kind: output, shape index: {}]  }
   0x1   :  { %v26_v0 = vld [vmem:[%s365_s0 + $0x48] sm:$0xf]  ;;  %v239_v1 = vld [vmem:[%s365_s0 + $0x98] sm:$0xf]  ;;  %v25_v3 = vld [vmem:[%s365_s0 + $0x40] sm:$0xf] }
   0x2   :  { %v24_v2 = vld [vmem:[%s365_s0 + $0x38] sm:$0xff]  ;;  %227 = vmatprep.subr.msk.mxu0 %vm36_vm0, %v26_v0  ;;  %240 = vmatprep.subr.msk.mxu1 %vm36_vm0, %v239_v1  ;;  %v238_v4 = vld [vmem:[%s365_s0 + $0x90] sm:$0xf]  ;;  %v237_v5 = vld [vmem:[%s365_s0 + $0x88] sm:$0xff] }
   0x3   :  { %228 = vmatpush1.msk.msra.mxu0 %vm36_vm0, %v25_v3  ;;  %241 = vmatpush1.msk.msra.mxu1 %vm36_vm0, %v238_v4  ;;  %v23_v6 = vld [vmem:[%s365_s0 + $0x30] sm:$0xff]  ;;  %v236_v7 = vld [vmem:[%s365_s0 + $0x80] sm:$0xff]  ;;  %v22_v8 = vld [vmem:[%s365_s0 + $0x28] sm:$0xff] }
   0x4   :  { %67 = vmatprep.subr.mxu0 %v24_v2  ;;  %159 = vmatprep.subr.mxu1 %v237_v5  ;;  %v235_v9 = vld [vmem:[%s365_s0 + $0x78] sm:$0xff]  ;;  %v21_v10 = vld [vmem:[%s365_s0 + $0x20] sm:$0xff]  ;;  %v234_v11 = vld [vmem:[%s365_s0 + $0x70] sm:$0xff] }
   0x5   :  { %68 = vmatpush1.msra.mxu0 %v23_v6  ;;  %160 = vmatpush1.msra.mxu1 %v236_v7  ;;  %v20_v12 = vld [vmem:[%s365_s0 + $0x18] sm:$0xff]  ;;  %v233_v13 = vld [vmem:[%s365_s0 + $0x68] sm:$0xff]  ;;  %v19_v14 = vld [vmem:[%s365_s0 + $0x10] sm:$0xff] }
   0x6   :  { %69 = vmatprep.subr.mxu0 %v22_v8  ;;  %161 = vmatprep.subr.mxu1 %v235_v9  ;;  %v232_v15 = vld [vmem:[%s365_s0 + $0x60] sm:$0xff]  ;;  %v18_v16 = vld [vmem:[%s365_s0 + $0x8] sm:$0xff]  ;;  %v231_v17 = vld [vmem:[%s365_s0 + $0x58] sm:$0xff] }
   0x7   :  { %70 = vmatpush1.msra.mxu0 %v21_v10  ;;  %162 = vmatpush1.msra.mxu1 %v234_v11  ;;  %v17_v18 = vld [vmem:[%s365_s0] sm:$0xff] }
   0x8   :  { %71 = vmatprep.subr.mxu0 %v20_v12  ;;  %163 = vmatprep.subr.mxu1 %v233_v13 }
   0x9   :  { %8 = vsyncpa [#allocation3], 0  ;;  %72 = vmatpush1.msra.mxu0 %v19_v14  ;;  %164 = vmatpush1.msra.mxu1 %v232_v15  ;;  %v230_v19 = vld [vmem:[%s365_s0 + $0x50] sm:$0xff]  ;;  %v15_v20 = vld [vmem:[%s366_s1] sm:$0xff]  ;;  %vm32_vm1 = vcmask 293888   ;;  %v271_v21 = vmov 0.0  }
   0xa   :  { %73 = vmatprep.subr.mxu0 %v18_v16  ;;  %165 = vmatprep.subr.mxu1 %v231_v17  ;;  %v16_v22 = vld [vmem:[%s367_s2] sm:$0xff]  ;;  %v272_v23 = vmov 0   ;;  %s273_s0 = smov [#allocation2]  }
   0xb   :  { %74 = vmatpush1.msra.mxu0 %v17_v18  ;;  %107 = vmatprep.mubr.f32.mxu0 %v271_v21  ;;  %s216_s1 = sshll.u32 %s273_s0, 4  ;;  %s217_s1 = int_to_ptr.vmem [resolvable:$true] %s216_s1 }
   0xc   :  { %166 = vmatpush1.msra.mxu1 %v230_v19  ;;  %199 = vmatprep.mubr.f32.mxu1 %v271_v21  ;;  %s249_s2 = scalar_lea.vmem %s217_s1, 512  ;;  %p254_p1 = scmp.lt.s32.totalorder %s217_s1, %s217_s1 }
   0xd   :  { %229 = vmatmul.mubr.msk.f32.vlgmr.msra.gmra.mxu0 %vm32_vm1, %v15_v20  ;;  %242 = vmatmul.mubr.msk.f32.vlgmr.msra.gmra.mxu1 %vm32_vm1, %v15_v20  ;;  %p250_p0 = scmp.ne.s32.totalorder %s217_s1, %s249_s2  ;;  %p255_p2 = scmp.lt.s32.totalorder %s249_s2, %s249_s2 }
   0xe   :  { %248 = vset.pattern.permute.xlu0 %v272_v23 }
   0xf   :  { %29 = vperm.xlu0 %248, %v16_v22   ;;  %p256_p3 = por %p255_p2, %p254_p1 }
  0x11   :  { %p257_p4 = pnand %p256_p3, %p250_p0 }
  0x8a   :  { %v30_v24 = vpop.permute.xlu0 %29 }
  0xcd   :  { %v109_v25 = vpop.f32.mrf.mxu0  ;;  %v201_v26 = vpop.f32.mrf.mxu1 }
  0xce   :  { %v110_v27 = vadd.f32 %v109_v25, %v30_v24  ;;  %v202_v28 = vadd.f32 %v201_v26, %v30_v24 }
  0xcf   :  { %v111_v29 = vpop.f32.mrf.mxu0  ;;  %v203_v30 = vpop.f32.mrf.mxu1 }
  0xd0   :  { %v114_v31 = vmax.f32 %v110_v27, 0.0  ;;  %v206_v32 = vmax.f32 %v202_v28, 0.0  ;;  %v112_v33 = vadd.f32 %v111_v29, %v30_v24  ;;  %v204_v34 = vadd.f32 %v203_v30, %v30_v24 }
  0xd2   :  { %116 = vst [vmem:[#allocation2] sm:$0xff] %v114_v31  ;;  %209 = vst [vmem:[#allocation2 + $0x10] sm:$0xff] %v206_v32  ;;  %v115_v35 = vmax.f32 %v112_v33, 0.0  ;;  %v207_v36 = vmax.f32 %v204_v34, 0.0 }
  0xd4   :  { %117 = vst [vmem:[#allocation2 + $0x8] sm:$0xff] %v115_v35  ;;  %210 = vst [vmem:[#allocation2 + $0x18] sm:$0xff] %v207_v36 }
  0xd5   :  { %260 = shalt.err (!%p257_p4)
}
  0xd6   :  { %s274_s29 = smov 256   ;;  %s275_s30 = smov 16  }
  0xd7   :  { %222 = dma.vmem_to_hbm [thread:$0]  %s217_s1, 512, %s368_s3, [#allocation3], %s274_s29, %s274_s29, %s275_s30  }
  0xd8   :  { %269 = dma.done.wait [#allocation3], 512  }
  0xd9   :  { %270 = vsyncadd [#allocation3], 4294966784 }
  0xda   :  { %226 = vsyncpa [#allocation3], 1 }

</bundles_post_ra>
